<compile_context>
chip_gen: v6e
topology: v6e:2x2x1
jax: 0.10.0
libtpu: 0.0.40
codegen_flags: <defaults>
</compile_context>

<pallas_src>
import jax
import jax.numpy as jnp
from jax.experimental import pallas as pl
from jax.experimental.pallas import tpu as pltpu

_BUDGET_BYTES = 40 * 1024 * 1024  # target double-buffered per-step working set


def _largest_divisor_multiple(n, base, cap):
    """Largest d with d % base == 0, n % d == 0, d <= cap (assumes n % base == 0)."""
    best = base
    m = n // base
    for k in range(1, m + 1):
        cand = base * k
        if cand > cap:
            break
        if n % cand == 0:
            best = cand
    return best


def _vmem_limit_bytes(resident_bytes):
    return int(min(max(resident_bytes + (8 << 20), 32 << 20), 112 << 20))


# --------------------------------------------------------------------------- #
# Single-pass fused kernel (full (N1, N2) block, TB batch elements per step).  #
# --------------------------------------------------------------------------- #
def _pmata_fused_kernel(wm1_ref, rho_ref, s_ref, os_ref, pm_ref, alpha_ref, beta_ref):
    wm1 = jnp.maximum(wm1_ref[0], 0.0)                     # torch.clamp(wm1, min=0)
    rho = rho_ref[0]
    osr = jnp.maximum(os_ref[...], 0.0)                    # torch.clamp(os, min=0)
    # 2*(sigmoid(x) - 0.5) == tanh(x/2): single EUP op per element.
    alpha_col = jnp.tanh(0.5 * wm1 * jnp.max(osr, axis=2, keepdims=True))  # (TB, N1, 1)
    beta_row = jnp.tanh(0.5 * wm1 * jnp.max(osr, axis=1, keepdims=True))   # (TB, 1, N2)
    # (1 - s) <= (alpha + beta) * rho   <=>   s >= 1 - (alpha + beta) * rho
    pm_ref[...] = (s_ref[...] >= 1.0 - (alpha_col + beta_row) * rho).astype(pm_ref.dtype)
    alpha_ref[...] = alpha_col
    beta_ref[...] = beta_row


def _pmata_fused(s, os_, rho_arr, wm1_arr, pm_dtype):
    B, N1, N2 = s.shape
    pm_bytes = jnp.dtype(pm_dtype).itemsize
    per_b = 2 * (8 + pm_bytes) * N1 * N2            # s + os + pm, double buffered
    tb = min(B, max(1, _BUDGET_BYTES // max(per_b, 1)))
    while tb > 1 and B % tb != 0:                   # tb must divide B
        tb -= 1
    resident = tb * per_b + 16 * tb * (N1 + N2)

    grid_spec = pltpu.PrefetchScalarGridSpec(
        num_scalar_prefetch=0,
        grid=(B // tb,),
        in_specs=[
            pl.BlockSpec(memory_space=pltpu.MemorySpace.SMEM),   # wm1 (scalar)
            pl.BlockSpec(memory_space=pltpu.MemorySpace.SMEM),   # rho (scalar)
            pl.BlockSpec((tb, N1, N2), lambda b: (b, 0, 0)),     # s
            pl.BlockSpec((tb, N1, N2), lambda b: (b, 0, 0)),     # os
        ],
        out_specs=[
            pl.BlockSpec((tb, N1, N2), lambda b: (b, 0, 0)),     # possible_mat
            pl.BlockSpec((tb, N1, 1), lambda b: (b, 0, 0)),      # alpha
            pl.BlockSpec((tb, 1, N2), lambda b: (b, 0, 0)),      # beta
        ],
    )
    pm, alpha, beta = pl.pallas_call(
        _pmata_fused_kernel,
        out_shape=(
            jax.ShapeDtypeStruct((B, N1, N2), pm_dtype),
            jax.ShapeDtypeStruct((B, N1, 1), jnp.float32),
            jax.ShapeDtypeStruct((B, 1, N2), jnp.float32),
        ),
        grid_spec=grid_spec,
        compiler_params=pltpu.CompilerParams(
            dimension_semantics=("parallel",),
            vmem_limit_bytes=_vmem_limit_bytes(resident),
        ),
    )(wm1_arr, rho_arr, s, os_)
    return pm, alpha.reshape(B, N1), beta.reshape(B, N2)


# --------------------------------------------------------------------------- #
# Two-pass tiled path for large (N1, N2): pass 1 alpha/beta, pass 2 pm.        #
# --------------------------------------------------------------------------- #
def _pmata_alpha_beta_kernel(wm1_ref, os_ref, alpha_ref, beta_ref, colmax_ref):
    i = pl.program_id(1)
    wm1 = jnp.maximum(wm1_ref[0], 0.0)
    osr = jnp.maximum(os_ref[...], 0.0)                                # (1, t1, N2)
    # alpha for this row tile (row max over the full N2 width).
    alpha_ref[...] = jnp.tanh(0.5 * wm1 * jnp.max(osr, axis=2, keepdims=True))
    tile_colmax = jnp.max(osr, axis=1)                                 # (1, N2)

    @pl.when(i == 0)
    def _():
        colmax_ref[...] = tile_colmax

    @pl.when(i > 0)
    def _():
        colmax_ref[...] = jnp.maximum(colmax_ref[...], tile_colmax)

    @pl.when(i == pl.num_programs(1) - 1)
    def _():
        beta_ref[0] = jnp.tanh(0.5 * wm1 * colmax_ref[...])


def _pmata_pm_kernel(rho_ref, s_ref, alpha_ref, beta_ref, pm_ref):
    rho = rho_ref[0]
    thresh = 1.0 - (alpha_ref[...] + beta_ref[...]) * rho              # (1, t1, t2)
    pm_ref[...] = (s_ref[...] >= thresh).astype(pm_ref.dtype)


def _pmata_two_pass(s, os_, rho_arr, wm1_arr, pm_dtype, tile_n1, tile_n2):
    B, N1, N2 = s.shape
    pm_bytes = jnp.dtype(pm_dtype).itemsize

    # ---- pass 1: alpha (row max) / beta (column max over all N1 tiles), reads os only
    max_t1 = max(8, (_BUDGET_BYTES // (8 * N2)) // 8 * 8)
    t1 = tile_n1 if tile_n1 is not None else _largest_divisor_multiple(N1, 8, min(max_t1, N1))
    resident1 = 2 * (t1 * N2 * 4 + t1 * 4 + N2 * 4) + N2 * 4
    alpha3, beta3 = pl.pallas_call(
        _pmata_alpha_beta_kernel,
        out_shape=(
            jax.ShapeDtypeStruct((B, N1, 1), jnp.float32),
            jax.ShapeDtypeStruct((B, 1, N2), jnp.float32),
        ),
        grid_spec=pltpu.PrefetchScalarGridSpec(
            num_scalar_prefetch=0,
            grid=(B, N1 // t1),
            in_specs=[
                pl.BlockSpec(memory_space=pltpu.MemorySpace.SMEM),       # wm1
                pl.BlockSpec((1, t1, N2), lambda b, i: (b, i, 0)),       # os
            ],
            out_specs=[
                pl.BlockSpec((1, t1, 1), lambda b, i: (b, i, 0)),        # alpha
                pl.BlockSpec((1, 1, N2), lambda b, i: (b, 0, 0)),        # beta (accum)
            ],
            scratch_shapes=[pltpu.VMEM((1, N2), jnp.float32)],
        ),
        compiler_params=pltpu.CompilerParams(
            dimension_semantics=("parallel", "arbitrary"),
            vmem_limit_bytes=_vmem_limit_bytes(resident1),
        ),
    )(wm1_arr, os_)

    # ---- pass 2: possible_mat, fully tiled over (N1, N2); reads s + tiny alpha/beta
    t2 = tile_n2 if tile_n2 is not None else _largest_divisor_multiple(N2, 128, min(N2, 2048))
    max_t1p2 = max(8, (_BUDGET_BYTES // (2 * (4 + pm_bytes) * t2)) // 8 * 8)
    t1p2 = tile_n1 if tile_n1 is not None else _largest_divisor_multiple(N1, 8, min(max_t1p2, N1))
    resident2 = 2 * ((4 + pm_bytes) * t1p2 * t2 + t1p2 * 4 + t2 * 4)
    pm = pl.pallas_call(
        _pmata_pm_kernel,
        out_shape=jax.ShapeDtypeStruct((B, N1, N2), pm_dtype),
        grid_spec=pltpu.PrefetchScalarGridSpec(
            num_scalar_prefetch=0,
            grid=(B, N1 // t1p2, N2 // t2),
            in_specs=[
                pl.BlockSpec(memory_space=pltpu.MemorySpace.SMEM),        # rho
                pl.BlockSpec((1, t1p2, t2), lambda b, i, j: (b, i, j)),   # s
                pl.BlockSpec((1, t1p2, 1), lambda b, i, j: (b, i, 0)),    # alpha
                pl.BlockSpec((1, 1, t2), lambda b, i, j: (b, 0, j)),      # beta
            ],
            out_specs=pl.BlockSpec((1, t1p2, t2), lambda b, i, j: (b, i, j)),
        ),
        compiler_params=pltpu.CompilerParams(
            dimension_semantics=("parallel", "parallel", "parallel"),
            vmem_limit_bytes=_vmem_limit_bytes(resident2),
        ),
    )(rho_arr, s, alpha3, beta3)
    return pm, alpha3.reshape(B, N1), beta3.reshape(B, N2)


# --------------------------------------------------------------------------- #
# Public wrapper (mirrors PMATA.forward for n1 = n2 = None).                   #
# --------------------------------------------------------------------------- #
def pmata_forward(s, os_, rho, wm1, *, out_dtype=jnp.int32,
                  force_two_pass=False, tile_n1=None, tile_n2=None):
    """JAX/Pallas equivalent of PMATA.forward with n1=n2=None."""
    # TODO(synk): explicit integer n1/n2 (sub-matrix slicing + zero-padding branch)
    # is not implemented; only the default n1 = n2 = None path is covered.
    matrix_input = s.ndim == 2
    if matrix_input:
        s = s[None]
    if os_.ndim == 2:
        os_ = os_[None]
    assert s.ndim == 3 and os_.ndim == 3, "input data shape not understood"
    assert s.shape == os_.shape

    B, N1, N2 = s.shape
    s = s.astype(jnp.float32)
    os_ = os_.astype(jnp.float32)
    wm1_arr = jnp.asarray(wm1, jnp.float32).reshape(1)
    rho_arr = jnp.asarray(rho, jnp.float32).reshape(1)

    if tile_n1 is not None:
        assert tile_n1 % 8 == 0 and N1 % tile_n1 == 0
    if tile_n2 is not None:
        assert tile_n2 % 128 == 0 and N2 % tile_n2 == 0

    pm_bytes = jnp.dtype(out_dtype).itemsize
    needs_tiling = 2 * (8 + pm_bytes) * N1 * N2 > _BUDGET_BYTES
    use_two_pass = force_two_pass or needs_tiling
    if use_two_pass and not (N1 % 8 == 0 and N2 % 128 == 0):
        # TODO(synk): two-pass tiling requires (8,128)-aligned N1/N2; ragged large
        # matrices fall back to the single full-block kernel (may exceed VMEM on v7x).
        use_two_pass = False

    if use_two_pass:
        pm, alpha, beta = _pmata_two_pass(s, os_, rho_arr, wm1_arr, out_dtype,
                                          tile_n1, tile_n2)
    else:
        pm, alpha, beta = _pmata_fused(s, os_, rho_arr, wm1_arr, out_dtype)

    if matrix_input:
        pm, alpha, beta = pm[0], alpha[0], beta[0]
    return [pm, alpha, beta]


# --------------------------------------------------------------------------- #
# Plain-JAX reference (mirrors the torch code, n1 = n2 = None path).           #
# --------------------------------------------------------------------------- #
def pmata_reference(s, os_, rho, wm1):
    if s.ndim == 2:
        s = s[None]
    if os_.ndim == 2:
        os_ = os_[None]
    osr = jnp.maximum(os_.astype(jnp.float32), 0.0)
    wm1c = jnp.maximum(jnp.asarray(wm1, jnp.float32), 0.0)
    alpha = (jax.nn.sigmoid(wm1c * jnp.max(osr, axis=2)) - 0.5) * 2.0   # (B, N1)
    beta = (jax.nn.sigmoid(wm1c * jnp.max(osr, axis=1)) - 0.5) * 2.0    # (B, N2)
    c_mat = 1.0 - s.astype(jnp.float32)
    c_base = (alpha[:, :, None] + beta[:, None, :]) * jnp.float32(rho)
    pm = jnp.where(c_mat <= c_base, 1, 0).astype(jnp.int32)
    return pm, alpha, beta, c_mat, c_base


def _check(name, outputs, s, os_, rho, wm1):
    pm, alpha, beta = outputs
    pm_ref, alpha_ref, beta_ref, c_mat, c_base = pmata_reference(s, os_, rho, wm1)
    assert jnp.allclose(alpha, alpha_ref, atol=1e-6), f"{name}: alpha mismatch"
    assert jnp.allclose(beta, beta_ref, atol=1e-6), f"{name}: beta mismatch"
    # tanh(x/2) == 2*(sigmoid(x)-0.5) exactly in math; allow elements sitting on
    # the threshold boundary to differ by the ~1 ulp between the formulations.
    near_boundary = jnp.abs(c_mat - c_base) < 1e-5
    assert bool(jnp.all((pm.astype(jnp.int32) == pm_ref) | near_boundary)), (
        f"{name}: possible_mat mismatch")


if __name__ == "__main__":
    key = jax.random.PRNGKey(0)
    k1, k2, k3, k4 = jax.random.split(key, 4)

    rho = 0.5
    wm1 = jnp.float32(2.0)
    wm2 = jnp.float32(1.0)   # unused in forward(), kept for module-shape parity
    wm3 = jnp.float32(1.0)   # unused in forward(), kept for module-shape parity

    # --- small problem: single-pass fused kernel, batch-folded (TB = B) ---
    B, N1, N2 = 2, 16, 16
    s = jax.random.uniform(k1, (B, N1, N2), dtype=jnp.float32)
    os_ = jax.random.normal(k2, (B, N1, N2), dtype=jnp.float32)
    out = pmata_forward(s, os_, rho, wm1)
    jax.block_until_ready(out)
    _check("fused", out, s, os_, rho, wm1)

    # --- larger, (8,128)-aligned problem: exercise the two-pass tiled kernels ---
    B2, M1, M2 = 2, 64, 256
    s2 = jax.random.uniform(k3, (B2, M1, M2), dtype=jnp.float32)
    os2 = jax.random.normal(k4, (B2, M1, M2), dtype=jnp.float32)
    out2 = pmata_forward(s2, os2, rho, wm1, force_two_pass=True,
                         tile_n1=16, tile_n2=128)
    jax.block_until_ready(out2)
    _check("two_pass", out2, s2, os2, rho, wm1)

    print("KERNEL_OK")
</pallas_src>

<mosaic_0001>
module attributes {stable_mosaic.version = 11 : i64} {
  func.func @_pmata_fused_kernel(%arg0: i32, %arg1: memref<1xf32, #tpu.memory_space<smem>>, %arg2: memref<1xf32, #tpu.memory_space<smem>>, %arg3: memref<2x16x16xf32, #tpu.memory_space<vmem>>, %arg4: memref<2x16x16xf32, #tpu.memory_space<vmem>>, %arg5: memref<2x16x16xi32, #tpu.memory_space<vmem>>, %arg6: memref<2x16x1xf32, #tpu.memory_space<vmem>>, %arg7: memref<2x1x16xf32, #tpu.memory_space<vmem>>) attributes {dimension_semantics = [#tpu.dimension_semantics<parallel>], iteration_bounds = array<i64: 1>, scalar_prefetch = 0 : i64, scratch_operands = 0 : i64, tpu.core_type = #tpu.core_type<tc>, window_params = [{transform_indices = @transform_0, window_bounds = array<i64: 1>}, {transform_indices = @transform_1, window_bounds = array<i64: 1>}, {transform_indices = @transform_2, window_bounds = array<i64: 2, 16, 16>}, {transform_indices = @transform_3, window_bounds = array<i64: 2, 16, 16>}, {transform_indices = @transform_4, window_bounds = array<i64: 2, 16, 16>}, {transform_indices = @transform_5, window_bounds = array<i64: 2, 16, 1>}, {transform_indices = @transform_6, window_bounds = array<i64: 2, 1, 16>}]} {
    %c0 = arith.constant 0 : index
    %0 = memref.load %arg1[%c0] : memref<1xf32, #tpu.memory_space<smem>>
    %cst = arith.constant 0.000000e+00 : f32
    %1 = arith.maximumf %0, %cst : f32
    %c0_0 = arith.constant 0 : index
    %2 = memref.load %arg2[%c0_0] : memref<1xf32, #tpu.memory_space<smem>>
    %c0_1 = arith.constant 0 : index
    %c0_2 = arith.constant 0 : index
    %c0_3 = arith.constant 0 : index
    %3 = vector.load %arg4[%c0_1, %c0_2, %c0_3] : memref<2x16x16xf32, #tpu.memory_space<vmem>>, vector<2x16x16xf32>
    %cst_4 = arith.constant 0.000000e+00 : f32
    %4 = vector.broadcast %cst_4 : f32 to vector<2x16x16xf32>
    %5 = arith.maximumf %3, %4 : vector<2x16x16xf32>
    %cst_5 = arith.constant 5.000000e-01 : f32
    %6 = arith.mulf %cst_5, %1 : f32
    %cst_6 = arith.constant dense<0xFF800000> : vector<2x16xf32>
    %7 = vector.multi_reduction <maximumf>, %5, %cst_6 [2] : vector<2x16x16xf32> to vector<2x16xf32>
    %8 = vector.shape_cast %7 : vector<2x16xf32> to vector<2x16x1xf32>
    %9 = vector.broadcast %6 : f32 to vector<2x16x1xf32>
    %10 = arith.mulf %9, %8 : vector<2x16x1xf32>
    %11 = math.tanh %10 : vector<2x16x1xf32>
    %cst_7 = arith.constant 5.000000e-01 : f32
    %12 = arith.mulf %cst_7, %1 : f32
    %cst_8 = arith.constant dense<0xFF800000> : vector<2x16xf32>
    %13 = vector.multi_reduction <maximumf>, %5, %cst_8 [1] : vector<2x16x16xf32> to vector<2x16xf32>
    %14 = vector.shape_cast %13 : vector<2x16xf32> to vector<2x1x16xf32>
    %15 = vector.broadcast %12 : f32 to vector<2x1x16xf32>
    %16 = arith.mulf %15, %14 : vector<2x1x16xf32>
    %17 = math.tanh %16 : vector<2x1x16xf32>
    %c0_9 = arith.constant 0 : index
    %c0_10 = arith.constant 0 : index
    %c0_11 = arith.constant 0 : index
    %18 = vector.load %arg3[%c0_9, %c0_10, %c0_11] : memref<2x16x16xf32, #tpu.memory_space<vmem>>, vector<2x16x16xf32>
    %19 = vector.broadcast %11 : vector<2x16x1xf32> to vector<2x16x16xf32>
    %20 = vector.broadcast %17 : vector<2x1x16xf32> to vector<2x16x16xf32>
    %21 = arith.addf %19, %20 : vector<2x16x16xf32>
    %22 = vector.broadcast %2 : f32 to vector<2x16x16xf32>
    %23 = arith.mulf %21, %22 : vector<2x16x16xf32>
    %cst_12 = arith.constant 1.000000e+00 : f32
    %24 = vector.broadcast %cst_12 : f32 to vector<2x16x16xf32>
    %25 = arith.subf %24, %23 : vector<2x16x16xf32>
    %26 = arith.cmpf oge, %18, %25 : vector<2x16x16xf32>
    %27 = arith.extui %26 : vector<2x16x16xi1> to vector<2x16x16xi32>
    %c0_13 = arith.constant 0 : index
    %c0_14 = arith.constant 0 : index
    %c0_15 = arith.constant 0 : index
    %28 = vector.load %arg5[%c0_13, %c0_14, %c0_15] : memref<2x16x16xi32, #tpu.memory_space<vmem>>, vector<2x16x16xi32>
    tpu.vector_store %arg5[%c0_13, %c0_14, %c0_15], %27 {strides = array<i32>} : memref<2x16x16xi32, #tpu.memory_space<vmem>>, vector<2x16x16xi32>,
    %c0_16 = arith.constant 0 : index
    %c0_17 = arith.constant 0 : index
    %c0_18 = arith.constant 0 : index
    %29 = vector.load %arg6[%c0_16, %c0_17, %c0_18] : memref<2x16x1xf32, #tpu.memory_space<vmem>>, vector<2x16x1xf32>
    tpu.vector_store %arg6[%c0_16, %c0_17, %c0_18], %11 {strides = array<i32>} : memref<2x16x1xf32, #tpu.memory_space<vmem>>, vector<2x16x1xf32>,
    %c0_19 = arith.constant 0 : index
    %c0_20 = arith.constant 0 : index
    %c0_21 = arith.constant 0 : index
    %30 = vector.load %arg7[%c0_19, %c0_20, %c0_21] : memref<2x1x16xf32, #tpu.memory_space<vmem>>, vector<2x1x16xf32>
    tpu.vector_store %arg7[%c0_19, %c0_20, %c0_21], %17 {strides = array<i32>} : memref<2x1x16xf32, #tpu.memory_space<vmem>>, vector<2x1x16xf32>,
    return
  }
  func.func @transform_0(%arg0: i32) -> i32 {
    %c0_i32 = arith.constant 0 : i32
    %c0_i32_0 = arith.constant 0 : i32
    return %c0_i32 : i32
  }
  func.func @transform_1(%arg0: i32) -> i32 {
    %c0_i32 = arith.constant 0 : i32
    %c0_i32_0 = arith.constant 0 : i32
    return %c0_i32 : i32
  }
  func.func @transform_2(%arg0: i32) -> (i32, i32, i32) {
    %c0_i32 = arith.constant 0 : i32
    %c0_i32_0 = arith.constant 0 : i32
    %c0_i32_1 = arith.constant 0 : i32
    return %arg0, %c0_i32, %c0_i32_0 : i32, i32, i32
  }
  func.func @transform_3(%arg0: i32) -> (i32, i32, i32) {
    %c0_i32 = arith.constant 0 : i32
    %c0_i32_0 = arith.constant 0 : i32
    %c0_i32_1 = arith.constant 0 : i32
    return %arg0, %c0_i32, %c0_i32_0 : i32, i32, i32
  }
  func.func @transform_4(%arg0: i32) -> (i32, i32, i32) {
    %c0_i32 = arith.constant 0 : i32
    %c0_i32_0 = arith.constant 0 : i32
    %c0_i32_1 = arith.constant 0 : i32
    return %arg0, %c0_i32, %c0_i32_0 : i32, i32, i32
  }
  func.func @transform_5(%arg0: i32) -> (i32, i32, i32) {
    %c0_i32 = arith.constant 0 : i32
    %c0_i32_0 = arith.constant 0 : i32
    %c0_i32_1 = arith.constant 0 : i32
    return %arg0, %c0_i32, %c0_i32_0 : i32, i32, i32
  }
  func.func @transform_6(%arg0: i32) -> (i32, i32, i32) {
    %c0_i32 = arith.constant 0 : i32
    %c0_i32_0 = arith.constant 0 : i32
    %c0_i32_1 = arith.constant 0 : i32
    return %arg0, %c0_i32, %c0_i32_0 : i32, i32, i32
  }
}

</mosaic_0001>

<bundles_post_ra>
// kernel: tpu_custom_call.1
= control target key start
LH: loop header
LB: loop body
LE: loop exit
PB: predicated region body
PF: predicated region fallthrough
CT: control target
= control target key end

     0   :  { %14 = vsyncpa [#allocation5], 0  ;;  %s385_s0 = inlined_call_operand.<no memory space> [shape: f32[1], index: 0, kind: input, shape index: {}]   ;;  %s386_s1 = inlined_call_operand.<no memory space> [shape: f32[1], index: 1, kind: input, shape index: {}]   ;;  %s387_s2 = inlined_call_operand.hbm [shape: f32[2,16,16], index: 2, kind: input, shape index: {}]   ;;  %s388_s3 = inlined_call_operand.hbm [shape: f32[2,16,16], index: 3, kind: input, shape index: {}]   ;;  %s389_s4 = inlined_call_operand.hbm [shape: s32[2,16,16], index: 4, kind: output, shape index: {0}]   ;;  %s390_s5 = inlined_call_operand.vmem [shape: f32[2,16,1], index: 5, kind: output, shape index: {1}]   ;;  %s391_s6 = inlined_call_operand.hbm [shape: f32[2,1,16], index: 6, kind: output, shape index: {2}]  }
   0x1   :  { %15 = vsyncpa [#allocation8], 0 }
   0x2   :  { %16 = vsyncpa [#allocation6], 0 }
   0x3   :  { %17 = vsyncpa [#allocation11], 0  ;;  %s289_s21 = smov [#allocation4]  }
   0x4   :  { %s27_s22 = sshll.u32 %s289_s21, 4  ;;  %s28_s22 = int_to_ptr.vmem [resolvable:$true] %s27_s22 }
   0x5   :  { %s209_s23 = scalar_lea.vmem %s28_s22, 512  ;;  %p214_p1 = scmp.lt.s32.totalorder %s28_s22, %s28_s22 }
   0x6   :  { %p210_p0 = scmp.ne.s32.totalorder %s28_s22, %s209_s23  ;;  %p215_p2 = scmp.lt.s32.totalorder %s209_s23, %s209_s23 }
   0x8   :  { %p216_p3 = por %p215_p2, %p214_p1 }
   0xa   :  { %p217_p4 = pnand %p216_p3, %p210_p0 }
   0xc   :  { %220 = shalt.err (!%p217_p4)
}
   0xd   :  { %s290_s24 = smov 128   ;;  %s291_s25 = smov 8  }
   0xe   :  { %33 = dma.hbm_to_vmem [thread:$0]  %s387_s2, 512, %s28_s22, [#allocation5], %s290_s24, %s290_s24, %s291_s25  }
   0xf   :  { %s292_s28 = smov [#allocation7]  }
  0x10   :  { %s39_s29 = sshll.u32 %s292_s28, 4  ;;  %s40_s29 = int_to_ptr.vmem [resolvable:$true] %s39_s29 }
  0x11   :  { %s229_s30 = scalar_lea.vmem %s40_s29, 512  ;;  %p234_p6 = scmp.lt.s32.totalorder %s40_s29, %s40_s29 }
  0x12   :  { %p230_p5 = scmp.ne.s32.totalorder %s40_s29, %s229_s30  ;;  %p235_p7 = scmp.lt.s32.totalorder %s229_s30, %s229_s30 }
  0x14   :  { %p236_p8 = por %p235_p7, %p234_p6 }
  0x16   :  { %p237_p9 = pnand %p236_p8, %p230_p5 }
  0x18   :  { %240 = shalt.err (!%p237_p9)
}
  0x19   :  { %45 = dma.hbm_to_vmem [thread:$0]  %s388_s3, 512, %s40_s29, [#allocation8], %s290_s24, %s290_s24, %s291_s25  }
  0x1a   :  { %281 = dma.done.wait [#allocation5], 512  }
  0x1b   :  { %282 = vsyncadd [#allocation5], 4294966784 }
  0x1c   :  { %283 = dma.done.wait [#allocation8], 512  }
  0x1d   :  { %284 = vsyncadd [#allocation8], 4294966784  ;;  %v57_v0 = vld [vmem:[#allocation7 + $0x10] sm:$0xff]  ;;  %vm64_vm0 = vcmask 130048   ;;  %v55_v1 = vld [vmem:[#allocation7] sm:$0xff]  ;;  %s293_s2 = smov 0.0  }
  0x1e   :  { %v58_v2 = vld [vmem:[#allocation7 + $0x18] sm:$0xff]  ;;  %v61_v3 = vmax.f32 %v57_v0, 0.0  ;;  %v59_v4 = vmax.f32 %v55_v1, 0.0  ;;  %v56_v6 = vld [vmem:[#allocation7 + $0x8] sm:$0xff]  ;;  %s53_s10 = smax.f32 %s293_s2, %s385_s0  ;;  %vm138_vm1 = vcmask 122880   ;;  %s294_s12 = smov [#allocation10]  }
  0x1f   :  { %v62_v5 = vmax.f32 %v58_v2, 0.0  ;;  %v60_v7 = vmax.f32 %v56_v6, 0.0  ;;  %s63_s11 = smul.f32 0.5, %s53_s10  ;;  %s160_s13 = sshll.u32 %s294_s12, 4  ;;  %s161_s13 = int_to_ptr.vmem [resolvable:$true] %s160_s13 }
  0x20   :  { %v71_v8 = vsel %vm64_vm0, %v61_v3, -inf  ;;  %v65_v9 = vsel %vm64_vm0, %v59_v4, -inf  ;;  %s241_s14 = scalar_lea.vmem %s161_s13, 32  ;;  %p246_p11 = scmp.lt.s32.totalorder %s161_s13, %s161_s13 }
  0x21   :  { %v74_v10 = vsel %vm64_vm0, %v62_v5, -inf  ;;  %72 = vmax.xlane.f32.xlu1 %v71_v8  ;;  %66 = vmax.xlane.f32.xlu0 %v65_v9  ;;  %v68_v12 = vsel %vm64_vm0, %v60_v7, -inf  ;;  %v77_v25 = vstv %s63_s11  ;;  %p242_p10 = scmp.ne.s32.totalorder %s161_s13, %s241_s14  ;;  %p247_p12 = scmp.lt.s32.totalorder %s241_s14, %s241_s14 }
  0x22   :  { %v93_v11 = vmax.f32 %v71_v8, %v74_v10  ;;  %v86_v13 = vmax.f32 %v65_v9, %v68_v12 }
  0x23   :  { %p248_p13 = por %p247_p12, %p246_p11 }
  0x24   :  { %v94_v14 = vrot.slane %v93_v11, 4  ;;  %v87_v15 = vrot.slane %v86_v13, 4 }
  0x25   :  { %75 = vmax.xlane.f32.xlu1 %v74_v10  ;;  %69 = vmax.xlane.f32.xlu0 %v68_v12  ;;  %p249_p0 = pnand %p248_p13, %p242_p10 }
  0x26   :  { %v95_v16 = vmax.f32 %v93_v11, %v94_v14  ;;  %v88_v17 = vmax.f32 %v86_v13, %v87_v15 }
  0x28   :  { %v96_v18 = vrot.slane %v95_v16, 2  ;;  %v89_v19 = vrot.slane %v88_v17, 2 }
  0x2a   :  { %v97_v20 = vmax.f32 %v95_v16, %v96_v18  ;;  %v90_v21 = vmax.f32 %v88_v17, %v89_v19 }
  0x2c   :  { %v98_v22 = vrot.slane %v97_v20, 1  ;;  %v91_v23 = vrot.slane %v90_v21, 1 }
  0x2e   :  { %v99_v24 = vmax.f32 %v97_v20, %v98_v22  ;;  %v92_v26 = vmax.f32 %v90_v21, %v91_v23 }
  0x30   :  { %v101_v27 = vmul.f32 %v99_v24, %v77_v25  ;;  %v100_v28 = vmul.f32 %v92_v26, %v77_v25 }
  0x32   :  { %189 = vtanh.f32 %v101_v27 }
  0x33   :  { %191 = vtanh.f32 %v100_v28 }
  0x3f   :  { %v190_v29 = vpop.eup %189 }
  0x40   :  { %v192_v30 = vpop.eup %191  ;;  %140 = vst.msk [vmem:[#allocation10 + $0x1] sm:$0x1] %vm138_vm1, %v190_v29 }
  0x41   :  { %139 = vst.msk [vmem:[#allocation10] sm:$0x1] %vm138_vm1, %v192_v30 }
  0x42   :  { %252 = shalt.err (!%p249_p0)
}
  0x43   :  { %s295_s0 = smov 16   ;;  %s296_s15 = smov 1   ;;  %vm133_vm2 = vcmask 7168   ;;  %v112_v40 = vstv %s386_s1  ;;  %v106_v46 = vld [vmem:[#allocation4 + $0x10] sm:$0xff]  ;;  %v104_v50 = vld [vmem:[#allocation4] sm:$0xff]  ;;  %v107_v55 = vld [vmem:[#allocation4 + $0x18] sm:$0xff] }
  0x44   :  { %166 = dma.vmem_to_hbm [thread:$0]  %s161_s13, 32, %s391_s6, [#allocation11], %s295_s0, %s295_s0, %s296_s15   ;;  %v297_v57 = vmov 0   ;;  %v105_v59 = vld [vmem:[#allocation4 + $0x8] sm:$0xff] }
  0x45   :  { %s298_s28 = smov [#allocation9]  }
  0x46   :  { %s146_s29 = sshll.u32 %s298_s28, 4  ;;  %s147_s29 = int_to_ptr.vmem [resolvable:$true] %s146_s29 }
  0x47   :  { %p266_p2 = scmp.lt.s32.totalorder %s147_s29, %s147_s29 }
  0xaa   :  { %v73_v31 = vpop.xlane.xlu1 %72  ;;  %v67_v32 = vpop.xlane.xlu0 %66 }
  0xab   :  { %v80_v33 = vmul.f32 %v77_v25, %v73_v31  ;;  %v78_v34 = vmul.f32 %v77_v25, %v67_v32 }
  0xad   :  { %193 = vtanh.f32 %v80_v33 }
  0xae   :  { %195 = vtanh.f32 %v78_v34  ;;  %v76_v35 = vpop.xlane.xlu1 %75  ;;  %v70_v36 = vpop.xlane.xlu0 %69 }
  0xaf   :  { %v81_v37 = vmul.f32 %v77_v25, %v76_v35  ;;  %v79_v38 = vmul.f32 %v77_v25, %v70_v36 }
  0xb1   :  { %197 = vtanh.f32 %v81_v37 }
  0xb2   :  { %199 = vtanh.f32 %v79_v38 }
  0xba   :  { %v194_v39 = vpop.eup %193 }
  0xbb   :  { %v196_v41 = vpop.eup %195  ;;  %v110_v42 = vadd.f32 %v194_v39, %v190_v29  ;;  %136 = vst.msk [vmem:[%s390_s5 + $0x10] sm:$0xff] %vm133_vm2, %v194_v39 }
  0xbc   :  { %v108_v43 = vadd.f32 %v196_v41, %v192_v30  ;;  %134 = vst.msk [vmem:[%s390_s5] sm:$0xff] %vm133_vm2, %v196_v41 }
  0xbd   :  { %v115_v44 = vmul.f32 %v112_v40, %v110_v42 }
  0xbe   :  { %v198_v45 = vpop.eup %197  ;;  %v113_v47 = vmul.f32 %v112_v40, %v108_v43 }
  0xbf   :  { %v200_v48 = vpop.eup %199  ;;  %v111_v49 = vadd.f32 %v198_v45, %v190_v29  ;;  %137 = vst.msk [vmem:[%s390_s5 + $0x18] sm:$0xff] %vm133_vm2, %v198_v45  ;;  %v119_v51 = vsub.f32 1.0, %v115_v44 }
  0xc0   :  { %v109_v52 = vadd.f32 %v200_v48, %v192_v30  ;;  %135 = vst.msk [vmem:[%s390_s5 + $0x8] sm:$0xff] %vm133_vm2, %v200_v48  ;;  %v117_v53 = vsub.f32 1.0, %v113_v47  ;;  %s261_s5 = scalar_lea.vmem %s147_s29, 512 }
  0xc1   :  { %v116_v54 = vmul.f32 %v112_v40, %v111_v49  ;;  %vm123_vm3 = vcmp.ge.f32.partialorder %v106_v46, %v119_v51  ;;  %p262_p1 = scmp.ne.s32.totalorder %s147_s29, %s261_s5  ;;  %p267_p3 = scmp.lt.s32.totalorder %s261_s5, %s261_s5 }
  0xc2   :  { %v114_v56 = vmul.f32 %v112_v40, %v109_v52  ;;  %vm121_vm4 = vcmp.ge.f32.partialorder %v104_v50, %v117_v53  ;;  %v127_v58 = vsel %vm123_vm3, 1, %v297_v57 }
  0xc3   :  { %v120_v60 = vsub.f32 1.0, %v116_v54  ;;  %v125_v61 = vsel %vm121_vm4, 1, %v297_v57  ;;  %131 = vst.msk [vmem:[#allocation9 + $0x10] sm:$0xff] %vm64_vm0, %v127_v58  ;;  %p268_p4 = por %p267_p3, %p266_p2 }
  0xc4   :  { %v118_v62 = vsub.f32 1.0, %v114_v56  ;;  %129 = vst.msk [vmem:[#allocation9] sm:$0xff] %vm64_vm0, %v125_v61 }
  0xc5   :  { %vm124_vm5 = vcmp.ge.f32.partialorder %v107_v55, %v120_v60  ;;  %p269_p5 = pnand %p268_p4, %p262_p1 }
  0xc6   :  { %vm122_vm6 = vcmp.ge.f32.partialorder %v105_v59, %v118_v62  ;;  %v128_v63 = vsel %vm124_vm5, 1, %v297_v57 }
  0xc7   :  { %v126_v0 = vsel %vm122_vm6, 1, %v297_v57  ;;  %132 = vst.msk [vmem:[#allocation9 + $0x18] sm:$0xff] %vm64_vm0, %v128_v63 }
  0xc8   :  { %130 = vst.msk [vmem:[#allocation9 + $0x8] sm:$0xff] %vm64_vm0, %v126_v0 }
  0xc9   :  { %272 = shalt.err (!%p269_p5)
}
  0xca   :  { %152 = dma.vmem_to_hbm [thread:$0]  %s147_s29, 512, %s389_s4, [#allocation6], %s290_s24, %s290_s24, %s291_s25  }
  0xcb   :  { %285 = dma.done.wait [#allocation6], 512  }
  0xcc   :  { %286 = vsyncadd [#allocation6], 4294966784 }
  0xcd   :  { %287 = dma.done.wait [#allocation11], 32  }
  0xce   :  { %288 = vsyncadd [#allocation11], 4294967264 }
  0xcf   :  { %175 = vsyncpa [#allocation5], 1 }
  0xd0   :  { %176 = vsyncpa [#allocation8], 1 }
  0xd1   :  { %177 = vsyncpa [#allocation6], 1 }
  0xd2   :  { %178 = vsyncpa [#allocation11], 1 }

</bundles_post_ra>
